<compile_context>
chip_gen: v6e
topology: v6e:2x2x1
jax: 0.10.0
libtpu: 0.0.40
codegen_flags: <defaults>
</compile_context>

<pallas_src>
import functools

import jax
import jax.numpy as jnp
from jax import lax
from jax.experimental import pallas as pl
from jax.experimental.pallas import tpu as pltpu


def _round_up(x, m):
    return (x + m - 1) // m * m


# ---------------------------------------------------------------------------
# Kernel 1: time-independent part — embed + ReLU + input gate pre-activations,
# one big batched matmul over all T*B rows ("parallel" grid over row tiles).
# ---------------------------------------------------------------------------
def _precompute_kernel(x_ref, w_emb_ref, b_emb_ref, w_ih_ref, b_ih_ref, gi_ref):
    v = jnp.dot(x_ref[...], w_emb_ref[...],
                preferred_element_type=jnp.float32) + b_emb_ref[...]
    v = jnp.maximum(v, 0.0)                                   # ReLU
    gi_ref[...] = jnp.dot(v.astype(jnp.bfloat16), w_ih_ref[...],
                          preferred_element_type=jnp.float32) + b_ih_ref[...]


# ---------------------------------------------------------------------------
# Kernel 2: sequential GRU recurrence + masked time-sum + fc.
# Grid iterates over time chunks; inside each grid step an unrolled fori_loop
# walks the Tc time steps.  h / acc live in VMEM scratch across grid steps.
# ---------------------------------------------------------------------------
def _recurrent_kernel(gi_ref, mask_ref, w_hh_ref, b_hh_ref, w_fc_ref, b_fc_ref,
                      out_ref, h_scr, acc_scr, *, tc, hp):
    c = pl.program_id(0)

    @pl.when(c == 0)
    def _init():
        h_scr[...] = jnp.zeros_like(h_scr)
        acc_scr[...] = jnp.zeros_like(acc_scr)

    w_hh = w_hh_ref[...]          # (Hp, 3Hp) bf16, hoisted out of the time loop
    b_hh = b_hh_ref[...]          # (1, 3Hp) f32

    def step(t, carry):
        h, acc = carry
        gi_t = gi_ref[t]          # (Bp, 3Hp) f32  (b_ih already folded in)
        m_t = mask_ref[t]         # (Bp, 1)  f32
        gh = jnp.dot(h.astype(jnp.bfloat16), w_hh,
                     preferred_element_type=jnp.float32) + b_hh
        # PyTorch gate order: r, z, n ; slices are 128-lane aligned (hp % 128 == 0)
        r = jax.nn.sigmoid(gi_t[:, :hp] + gh[:, :hp])
        z = jax.nn.sigmoid(gi_t[:, hp:2 * hp] + gh[:, hp:2 * hp])
        n = jnp.tanh(gi_t[:, 2 * hp:] + r * gh[:, 2 * hp:])
        h_new = (1.0 - z) * n + z * h
        return h_new, acc + h_new * m_t          # masked accumulation over time

    h_f, acc_f = lax.fori_loop(0, tc, step, (h_scr[...], acc_scr[...]),
                               unroll=True)
    h_scr[...] = h_f
    acc_scr[...] = acc_f

    @pl.when(c == pl.num_programs(0) - 1)
    def _finalize():
        # dropout == identity in eval mode; lane-dense (Bp, Lp) store
        out_ref[...] = jnp.dot(acc_f.astype(jnp.bfloat16), w_fc_ref[...],
                               preferred_element_type=jnp.float32) + b_fc_ref[...]


# ---------------------------------------------------------------------------
# Host-side layout plumbing + pallas_call wrappers.
# ---------------------------------------------------------------------------
def _pad_gate_mat(w, h, hp, k, kp):
    """(3h, k) PyTorch-stacked [r; z; n] -> (3hp, kp), each gate block zero-padded."""
    blocks = [jnp.pad(w[g * h:(g + 1) * h], ((0, hp - h), (0, kp - k)))
              for g in range(3)]
    return jnp.concatenate(blocks, axis=0)


def _pad_gate_vec(b, h, hp):
    """(1, 3h) -> (1, 3hp), per gate."""
    blocks = [jnp.pad(b[:, g * h:(g + 1) * h], ((0, 0), (0, hp - h)))
              for g in range(3)]
    return jnp.concatenate(blocks, axis=1)


def gru_forward(x, mask, params):
    T, B, C = x.shape
    V = params["w_emb"].shape[0]      # visit_size
    H = params["w_hh"].shape[1]       # hidden_size
    L = params["w_fc"].shape[0]       # n_labels
    assert V == H, "module requires visit_size == hidden_size (h0 shape)"

    Bp = _round_up(B, 8)       # sublane multiple
    Cp = _round_up(C, 128)     # lane multiples
    Hp = _round_up(H, 128)
    Lp = _round_up(L, 128)

    # Pre-transposed, zero-padded, bf16 matmul operands (biases stay f32).
    w_emb_t = jnp.pad(params["w_emb"], ((0, Hp - H), (0, Cp - C))).T.astype(jnp.bfloat16)  # (Cp, Hp)
    b_emb = jnp.pad(params["b_emb"], ((0, 0), (0, Hp - H)))                                # (1, Hp)
    w_ih_t = _pad_gate_mat(params["w_ih"], H, Hp, V, Hp).T.astype(jnp.bfloat16)            # (Hp, 3Hp)
    b_ih = _pad_gate_vec(params["b_ih"], H, Hp)                                            # (1, 3Hp)
    w_hh_t = _pad_gate_mat(params["w_hh"], H, Hp, H, Hp).T.astype(jnp.bfloat16)            # (Hp, 3Hp)
    b_hh = _pad_gate_vec(params["b_hh"], H, Hp)                                            # (1, 3Hp)
    w_fc_t = jnp.pad(params["w_fc"], ((0, Lp - L), (0, Hp - H))).T.astype(jnp.bfloat16)    # (Hp, Lp)
    b_fc = jnp.pad(params["b_fc"], ((0, 0), (0, Lp - L)))                                  # (1, Lp)

    x_p = jnp.pad(x, ((0, 0), (0, Bp - B), (0, Cp - C)))

    # ---------------- kernel 1: embed + relu + input gates, all T at once -----
    M = T * Bp
    tile_m = min(M, 512)
    Mp = _round_up(M, tile_m)
    x2d = jnp.pad(x_p.reshape(M, Cp), ((0, Mp - M), (0, 0))).astype(jnp.bfloat16)

    full1 = lambda a: pl.BlockSpec(a.shape, lambda i: (0,) * a.ndim)

    gi2d = pl.pallas_call(
        _precompute_kernel,
        out_shape=jax.ShapeDtypeStruct((Mp, 3 * Hp), jnp.float32),
        grid_spec=pltpu.PrefetchScalarGridSpec(
            num_scalar_prefetch=0,
            grid=(Mp // tile_m,),
            in_specs=[
                pl.BlockSpec((tile_m, Cp), lambda i: (i, 0)),
                full1(w_emb_t), full1(b_emb), full1(w_ih_t), full1(b_ih),
            ],
            out_specs=pl.BlockSpec((tile_m, 3 * Hp), lambda i: (i, 0)),
        ),
        compiler_params=pltpu.CompilerParams(dimension_semantics=("parallel",)),
    )(x2d, w_emb_t, b_emb, w_ih_t, b_ih)

    # ---------------- kernel 2: sequential recurrence over time chunks --------
    Tc = min(T, 16)
    Tp = _round_up(T, Tc)
    gi = gi2d[:M].reshape(T, Bp, 3 * Hp)
    gi = jnp.pad(gi, ((0, Tp - T), (0, 0), (0, 0)))             # padded steps: mask = 0
    mask3 = jnp.pad(mask.astype(jnp.float32), ((0, Tp - T), (0, Bp - B)))
    mask3 = mask3.reshape(Tp, Bp, 1)

    full2 = lambda a: pl.BlockSpec(a.shape, lambda c: (0,) * a.ndim)

    out_p = pl.pallas_call(
        functools.partial(_recurrent_kernel, tc=Tc, hp=Hp),
        out_shape=jax.ShapeDtypeStruct((Bp, Lp), jnp.float32),
        grid_spec=pltpu.PrefetchScalarGridSpec(
            num_scalar_prefetch=0,
            grid=(Tp // Tc,),
            in_specs=[
                pl.BlockSpec((Tc, Bp, 3 * Hp), lambda c: (c, 0, 0)),   # gi chunk
                pl.BlockSpec((Tc, Bp, 1), lambda c: (c, 0, 0)),        # mask chunk
                full2(w_hh_t), full2(b_hh), full2(w_fc_t), full2(b_fc),
            ],
            out_specs=pl.BlockSpec((Bp, Lp), lambda c: (0, 0)),
            scratch_shapes=[pltpu.VMEM((Bp, Hp), jnp.float32),    # hidden state
                            pltpu.VMEM((Bp, Hp), jnp.float32)],   # masked-sum acc
        ),
        compiler_params=pltpu.CompilerParams(dimension_semantics=("arbitrary",)),
    )(gi, mask3, w_hh_t, b_hh, w_fc_t, b_fc)

    return out_p[:B, :L]


# ---------------------------------------------------------------------------
# Pure-JAX f32 reference mirroring the PyTorch forward (eval mode).
# ---------------------------------------------------------------------------
def gru_reference(x, mask, params):
    H = params["w_hh"].shape[1]
    v = jnp.maximum(jnp.einsum("tbc,vc->tbv", x, params["w_emb"]) + params["b_emb"], 0.0)

    def step(h, inp):
        vt, mt = inp
        gi = vt @ params["w_ih"].T + params["b_ih"]
        gh = h @ params["w_hh"].T + params["b_hh"]
        r = jax.nn.sigmoid(gi[:, :H] + gh[:, :H])
        z = jax.nn.sigmoid(gi[:, H:2 * H] + gh[:, H:2 * H])
        n = jnp.tanh(gi[:, 2 * H:] + r * gh[:, 2 * H:])
        h_new = (1.0 - z) * n + z * h
        return h_new, h_new * mt[:, None]

    _, masked = lax.scan(step, jnp.zeros((x.shape[1], H), jnp.float32), (v, mask))
    s = masked.sum(0)
    return s @ params["w_fc"].T + params["b_fc"]


def init_params(key, n_codes, visit, hidden, n_labels):
    ks = jax.random.split(key, 10)
    u = lambda k, shape, s: jax.random.uniform(k, shape, jnp.float32, -s, s)
    return {
        "w_emb": u(ks[0], (visit, n_codes), 0.1),
        "b_emb": u(ks[1], (1, visit), 0.1),
        "w_ih":  u(ks[2], (3 * hidden, visit), 0.1),
        "b_ih":  u(ks[3], (1, 3 * hidden), 0.1),
        "w_hh":  u(ks[4], (3 * hidden, hidden), 0.1),
        "b_hh":  u(ks[5], (1, 3 * hidden), 0.1),
        "w_fc":  u(ks[6], (n_labels, hidden), 0.1),
        "b_fc":  u(ks[7], (1, n_labels), 0.1),
    }


if __name__ == "__main__":
    T, B = 8, 2
    n_codes, visit, hidden, n_labels = 16, 32, 32, 4   # visit_size == hidden_size (module requirement)

    key = jax.random.PRNGKey(0)
    kx, km, kp = jax.random.split(key, 3)
    x = jax.random.uniform(kx, (T, B, n_codes), jnp.float32)
    mask = (jax.random.uniform(km, (T, B)) > 0.3).astype(jnp.float32)  # per-(t,b) visit mask
    params = init_params(kp, n_codes, visit, hidden, n_labels)

    out = gru_forward(x, mask, params)
    out = jax.block_until_ready(out)

    ref = gru_reference(x, mask, params)
    assert out.shape == (B, n_labels)
    # bf16 MXU operands with f32 accumulation -> looser tolerance than pure f32.
    assert jnp.allclose(out, ref, atol=3e-2, rtol=3e-2), (out, ref)

    print("KERNEL_OK")
</pallas_src>

<mosaic_0001>
module attributes {stable_mosaic.version = 11 : i64} {
  func.func @_precompute_kernel(%arg0: i32, %arg1: memref<64x128xbf16, #tpu.memory_space<vmem>>, %arg2: memref<128x128xbf16, #tpu.memory_space<vmem>>, %arg3: memref<1x128xf32, #tpu.memory_space<vmem>>, %arg4: memref<128x384xbf16, #tpu.memory_space<vmem>>, %arg5: memref<1x384xf32, #tpu.memory_space<vmem>>, %arg6: memref<64x384xf32, #tpu.memory_space<vmem>>) attributes {dimension_semantics = [#tpu.dimension_semantics<parallel>], iteration_bounds = array<i64: 1>, scalar_prefetch = 0 : i64, scratch_operands = 0 : i64, tpu.core_type = #tpu.core_type<tc>, window_params = [{transform_indices = @transform_0, window_bounds = array<i64: 64, 128>}, {pipeline_mode = #tpu.pipeline_mode<synchronous>, transform_indices = @transform_1, window_bounds = array<i64: 128, 128>}, {pipeline_mode = #tpu.pipeline_mode<synchronous>, transform_indices = @transform_2, window_bounds = array<i64: 1, 128>}, {pipeline_mode = #tpu.pipeline_mode<synchronous>, transform_indices = @transform_3, window_bounds = array<i64: 128, 384>}, {pipeline_mode = #tpu.pipeline_mode<synchronous>, transform_indices = @transform_4, window_bounds = array<i64: 1, 384>}, {transform_indices = @transform_5, window_bounds = array<i64: 64, 384>}]} {
    %c0 = arith.constant 0 : index
    %c0_0 = arith.constant 0 : index
    %0 = vector.load %arg1[%c0, %c0_0] : memref<64x128xbf16, #tpu.memory_space<vmem>>, vector<64x128xbf16>
    %c0_1 = arith.constant 0 : index
    %c0_2 = arith.constant 0 : index
    %1 = vector.load %arg2[%c0_1, %c0_2] : memref<128x128xbf16, #tpu.memory_space<vmem>>, vector<128x128xbf16>
    %cst = arith.constant dense<0.000000e+00> : vector<64x128xf32>
    %2 = tpu.matmul %0, %1, %cst {dimension_numbers = #tpu.dot_dimension_numbers<[1], [0], [0], [1], [0, 0, 1, 1], [], []>} : vector<64x128xbf16>, vector<128x128xbf16>, vector<64x128xf32> -> vector<64x128xf32>
    %c0_3 = arith.constant 0 : index
    %c0_4 = arith.constant 0 : index
    %3 = vector.load %arg3[%c0_3, %c0_4] : memref<1x128xf32, #tpu.memory_space<vmem>>, vector<1x128xf32>
    %4 = vector.broadcast %3 : vector<1x128xf32> to vector<64x128xf32>
    %5 = arith.addf %2, %4 : vector<64x128xf32>
    %cst_5 = arith.constant 0.000000e+00 : f32
    %6 = vector.broadcast %cst_5 : f32 to vector<64x128xf32>
    %7 = arith.maximumf %5, %6 : vector<64x128xf32>
    %8 = arith.truncf %7 : vector<64x128xf32> to vector<64x128xbf16>
    %c0_6 = arith.constant 0 : index
    %c0_7 = arith.constant 0 : index
    %9 = vector.load %arg4[%c0_6, %c0_7] : memref<128x384xbf16, #tpu.memory_space<vmem>>, vector<128x384xbf16>
    %cst_8 = arith.constant dense<0.000000e+00> : vector<64x384xf32>
    %10 = tpu.matmul %8, %9, %cst_8 {dimension_numbers = #tpu.dot_dimension_numbers<[1], [0], [0], [1], [0, 0, 1, 1], [], []>} : vector<64x128xbf16>, vector<128x384xbf16>, vector<64x384xf32> -> vector<64x384xf32>
    %c0_9 = arith.constant 0 : index
    %c0_10 = arith.constant 0 : index
    %11 = vector.load %arg5[%c0_9, %c0_10] : memref<1x384xf32, #tpu.memory_space<vmem>>, vector<1x384xf32>
    %12 = vector.broadcast %11 : vector<1x384xf32> to vector<64x384xf32>
    %13 = arith.addf %10, %12 : vector<64x384xf32>
    %c0_11 = arith.constant 0 : index
    %c0_12 = arith.constant 0 : index
    %14 = vector.load %arg6[%c0_11, %c0_12] : memref<64x384xf32, #tpu.memory_space<vmem>>, vector<64x384xf32>
    tpu.vector_store %arg6[%c0_11, %c0_12], %13 {strides = array<i32>} : memref<64x384xf32, #tpu.memory_space<vmem>>, vector<64x384xf32>,
    return
  }
  func.func @transform_0(%arg0: i32) -> (i32, i32) {
    %c0_i32 = arith.constant 0 : i32
    %c0_i32_0 = arith.constant 0 : i32
    return %arg0, %c0_i32 : i32, i32
  }
  func.func @transform_1(%arg0: i32) -> (i32, i32) {
    %c0_i32 = arith.constant 0 : i32
    %c0_i32_0 = arith.constant 0 : i32
    %c0_i32_1 = arith.constant 0 : i32
    return %c0_i32, %c0_i32_0 : i32, i32
  }
  func.func @transform_2(%arg0: i32) -> (i32, i32) {
    %c0_i32 = arith.constant 0 : i32
    %c0_i32_0 = arith.constant 0 : i32
    %c0_i32_1 = arith.constant 0 : i32
    return %c0_i32, %c0_i32_0 : i32, i32
  }
  func.func @transform_3(%arg0: i32) -> (i32, i32) {
    %c0_i32 = arith.constant 0 : i32
    %c0_i32_0 = arith.constant 0 : i32
    %c0_i32_1 = arith.constant 0 : i32
    return %c0_i32, %c0_i32_0 : i32, i32
  }
  func.func @transform_4(%arg0: i32) -> (i32, i32) {
    %c0_i32 = arith.constant 0 : i32
    %c0_i32_0 = arith.constant 0 : i32
    %c0_i32_1 = arith.constant 0 : i32
    return %c0_i32, %c0_i32_0 : i32, i32
  }
  func.func @transform_5(%arg0: i32) -> (i32, i32) {
    %c0_i32 = arith.constant 0 : i32
    %c0_i32_0 = arith.constant 0 : i32
    return %arg0, %c0_i32 : i32, i32
  }
}

</mosaic_0001>

<bundles_post_ra>
// kernel: tpu_custom_call.1
= control target key start
LH: loop header
LB: loop body
LE: loop exit
PB: predicated region body
PF: predicated region fallthrough
CT: control target
= control target key end

     0   :  { %10 = vsyncpa [#allocation3], 0  ;;  %s977_s0 = inlined_call_operand.hbm [shape: bf16[64,128], index: 0, kind: input, shape index: {}]   ;;  %s978_s1 = inlined_call_operand.hbm [shape: bf16[128,128], index: 1, kind: input, shape index: {}]   ;;  %s979_s2 = inlined_call_operand.vmem [shape: f32[1,128], index: 2, kind: input, shape index: {}]   ;;  %s980_s3 = inlined_call_operand.hbm [shape: bf16[128,384], index: 3, kind: input, shape index: {}]   ;;  %s981_s4 = inlined_call_operand.vmem [shape: f32[1,384], index: 4, kind: input, shape index: {}]   ;;  %s982_s5 = inlined_call_operand.hbm [shape: f32[64,384], index: 5, kind: output, shape index: {}]  }
   0x1   :  { %11 = vsyncpa [#allocation6], 0 }
   0x2   :  { %12 = vsyncpa [#allocation4], 0  ;;  %s866_s18 = smov [#allocation5]   ;;  %s867_s20 = smov [#allocation2]  }
   0x3   :  { %s30_s19 = sshll.u32 %s866_s18, 4  ;;  %s18_s21 = sshll.u32 %s867_s20, 4  ;;  %s31_s19 = int_to_ptr.vmem [resolvable:$true] %s30_s19  ;;  %s19_s21 = int_to_ptr.vmem [resolvable:$true] %s18_s21 }
   0x4   :  { %s788_s22 = scalar_lea.vmem %s31_s19, 1024  ;;  %p793_p1 = scmp.lt.s32.totalorder %s31_s19, %s31_s19 }
   0x5   :  { %p789_p0 = scmp.ne.s32.totalorder %s31_s19, %s788_s22  ;;  %p794_p2 = scmp.lt.s32.totalorder %s788_s22, %s788_s22 }
   0x7   :  { %p795_p3 = por %p794_p2, %p793_p1 }
   0x9   :  { %p796_p4 = pnand %p795_p3, %p789_p0 }
   0xb   :  { %799 = shalt.err (!%p796_p4)
}
   0xc   :  { %s868_s23 = smov 64   ;;  %s869_s24 = smov 4  }
   0xd   :  { %36 = dma.hbm_to_vmem [thread:$0]  %s978_s1, 1024, %s31_s19, [#allocation6], %s868_s23, %s868_s23, %s869_s24  }
   0xe   :  { %s808_s27 = scalar_lea.vmem %s19_s21, 512  ;;  %p813_p6 = scmp.lt.s32.totalorder %s19_s21, %s19_s21 }
   0xf   :  { %p809_p5 = scmp.ne.s32.totalorder %s19_s21, %s808_s27  ;;  %p814_p7 = scmp.lt.s32.totalorder %s808_s27, %s808_s27 }
  0x11   :  { %p815_p8 = por %p814_p7, %p813_p6 }
  0x13   :  { %p816_p9 = pnand %p815_p8, %p809_p5 }
  0x15   :  { %819 = shalt.err (!%p816_p9)
}
  0x16   :  { %24 = dma.hbm_to_vmem [thread:$0]  %s977_s0, 512, %s19_s21, [#allocation3], %s868_s23, %s868_s23, %s869_s24  }
  0x17   :  { %s870_s30 = smov [#allocation7]  }
  0x18   :  { %s44_s6 = sshll.u32 %s870_s30, 4  ;;  %s45_s6 = int_to_ptr.vmem [resolvable:$true] %s44_s6 }
  0x19   :  { %s828_s7 = scalar_lea.vmem %s45_s6, 3072  ;;  %p833_p11 = scmp.lt.s32.totalorder %s45_s6, %s45_s6 }
  0x1a   :  { %p829_p10 = scmp.ne.s32.totalorder %s45_s6, %s828_s7  ;;  %p834_p12 = scmp.lt.s32.totalorder %s828_s7, %s828_s7 }
  0x1c   :  { %p835_p13 = por %p834_p12, %p833_p11 }
  0x1e   :  { %p836_p0 = pnand %p835_p13, %p829_p10 }
  0x20   :  { %839 = shalt.err (!%p836_p0)
}
  0x21   :  { %s871_s1 = smov 192   ;;  %s872_s8 = smov 12  }
  0x22   :  { %50 = dma.hbm_to_vmem [thread:$0]  %s980_s3, 3072, %s45_s6, [#allocation6], %s871_s1, %s871_s1, %s872_s8  }
  0x23   :  { %860 = dma.done.wait [#allocation3], 512  }
  0x24   :  { %861 = vsyncadd [#allocation3], 4294966784 }
  0x25   :  { %862 = dma.done.wait [#allocation6], 4096  }
  0x26   :  { %863 = vsyncadd [#allocation6], 4294963200  ;;  %v736_v0 = vld [vmem:[#allocation5 + $0x38] sm:$0xff]   ;;  %v737_v1 = vld [vmem:[#allocation5 + $0x30] sm:$0xff]   ;;  %v873_v36 = vmov 0  }
  0x27   :  { %661 = vmatprep.subr.bf16.mxu0 %v736_v0  ;;  %v738_v2 = vld [vmem:[#allocation5 + $0x28] sm:$0xff]   ;;  %v739_v3 = vld [vmem:[#allocation5 + $0x20] sm:$0xff]   ;;  %v740_v5 = vld [vmem:[#allocation5 + $0x18] sm:$0xff]   ;;  %452 = vmatprep.mubr.bf16.mxu1 %v873_v36 }
  0x28   :  { %662 = vmatpush3.bf16.msra.mxu0 %v736_v0  ;;  %v744_v4 = vld [vmem:[#allocation2] sm:$0xff]   ;;  %v748_v6 = vld [vmem:[#allocation7 + $0xac] ss:$12 sps:$4 sm:$0xff]   ;;  %v750_v7 = vld [vmem:[#allocation7 + $0xa8] ss:$12 sps:$4 sm:$0xff]  }
  0x29   :  { %663 = vmatprep.subr.bf16.mxu0 %v737_v1  ;;  %677 = vmatprep.mubr.bf16.mxu0 %v744_v4  ;;  %v752_v8 = vld [vmem:[#allocation7 + $0x94] ss:$12 sps:$4 sm:$0xff]   ;;  %v754_v9 = vld [vmem:[#allocation7 + $0x90] ss:$12 sps:$4 sm:$0xff]   ;;  %v742_v12 = vld [vmem:[#allocation5 + $0x8] sm:$0xff]  }
  0x2a   :  { %420 = vmatprep.subr.bf16.mxu1 %v748_v6  ;;  %v741_v10 = vld [vmem:[#allocation5 + $0x10] sm:$0xff]   ;;  %v756_v11 = vld [vmem:[#allocation7 + $0x7c] ss:$12 sps:$4 sm:$0xff]   ;;  %v758_v13 = vld [vmem:[#allocation7 + $0x78] ss:$12 sps:$4 sm:$0xff]  }
  0x2b   :  { %421 = vmatpush1.bf16.msra.mxu1 %v750_v7  ;;  %v760_v14 = vld [vmem:[#allocation7 + $0x64] ss:$12 sps:$4 sm:$0xff]   ;;  %v762_v16 = vld [vmem:[#allocation7 + $0x60] ss:$12 sps:$4 sm:$0xff]   ;;  %v766_v18 = vld [vmem:[#allocation7 + $0x48] ss:$12 sps:$4 sm:$0xff]  }
  0x2c   :  { %664 = vmatpush3.bf16.msra.mxu0 %v737_v1  ;;  %422 = vmatprep.subr.bf16.mxu1 %v752_v8  ;;  %v743_v15 = vld [vmem:[#allocation5] sm:$0xff]   ;;  %v764_v17 = vld [vmem:[#allocation7 + $0x4c] ss:$12 sps:$4 sm:$0xff]   ;;  %v916_v19 = vld [vmem:[#allocation7 + $0xb0] ss:$12 sps:$4 sm:$0xff]  }
  0x2d   :  { %665 = vmatprep.subr.bf16.mxu0 %v738_v2  ;;  %v745_v20 = vld [vmem:[#allocation2 + $0x8] sm:$0xff]   ;;  %v746_v21 = vld [vmem:[#allocation2 + $0x10] sm:$0xff]   ;;  %v919_v22 = vld [vmem:[#allocation7 + $0x98] ss:$12 sps:$4 sm:$0xff]  }
  0x2e   :  { %v923_v23 = vld [vmem:[#allocation7 + $0x80] ss:$12 sps:$4 sm:$0xff]   ;;  %v747_v24 = vld [vmem:[#allocation2 + $0x18] sm:$0xff]   ;;  %v927_v25 = vld [vmem:[#allocation7 + $0x68] ss:$12 sps:$4 sm:$0xff]  }
  0x2f   :  { %423 = vmatpush1.bf16.msra.mxu1 %v754_v9  ;;  %v931_v26 = vld [vmem:[#allocation7 + $0x50] ss:$12 sps:$4 sm:$0xff]   ;;  %v768_v27 = vld [vmem:[#allocation7 + $0x34] ss:$12 sps:$4 sm:$0xff]   ;;  %v936_v29 = vld [vmem:[#allocation7 + $0x38] ss:$12 sps:$4 sm:$0xff]  }
  0x30   :  { %666 = vmatpush3.bf16.msra.mxu0 %v738_v2  ;;  %424 = vmatprep.subr.bf16.mxu1 %v756_v11  ;;  %v770_v28 = vld [vmem:[#allocation7 + $0x30] ss:$12 sps:$4 sm:$0xff]   ;;  %v774_v31 = vld [vmem:[#allocation7 + $0x18] ss:$12 sps:$4 sm:$0xff]   ;;  %v940_v32 = vld [vmem:[#allocation7 + $0x20] ss:$12 sps:$4 sm:$0xff]   ;;  %v277_v2 = vlaneseq }
  0x31   :  { %667 = vmatprep.subr.bf16.mxu0 %v739_v3  ;;  %v772_v30 = vld [vmem:[#allocation7 + $0x1c] ss:$12 sps:$4 sm:$0xff]   ;;  %v776_v33 = vld [vmem:[#allocation7 + $0x4] ss:$12 sps:$4 sm:$0xff]   ;;  %v778_v34 = vld [vmem:[#allocation7] ss:$12 sps:$4 sm:$0xff]  }
  0x32   :  { %v779_v35 = vld [vmem:[#allocation7 + $0x8] ss:$12 sps:$4 sm:$0xff]   ;;  %v600_v39 = vld [vmem:[%s979_s2] ss:$0 sm:$0xff] }
  0x33   :  { %425 = vmatpush1.bf16.msra.mxu1 %v758_v13 }
  0x34   :  { %668 = vmatpush3.bf16.msra.mxu0 %v739_v3  ;;  %426 = vmatprep.subr.bf16.mxu1 %v760_v14  ;;  %v278_v3 = vshrl.u32 %v277_v2, 7 }
  0x35   :  { %669 = vmatprep.subr.bf16.mxu0 %v740_v5 }
  0x36   :  { %v279_v4 = vsub.s32 0, %v278_v3  ;;  %v287_v6 = vsub.s32 2, %v278_v3  ;;  %v283_v7 = vsub.s32 1, %v278_v3 }
  0x37   :  { %427 = vmatpush1.bf16.msra.mxu1 %v762_v16 }
  0x38   :  { %670 = vmatpush3.bf16.msra.mxu0 %v740_v5  ;;  %428 = vmatprep.subr.bf16.mxu1 %v764_v17  ;;  %v275_v5 = vld [vmem:[%s981_s4] sm:$0x7]  ;;  %s874_s4 = smov [#allocation8]  }
  0x39   :  { %671 = vmatprep.subr.bf16.mxu0 %v741_v10  ;;  %v280_v8 = vrot.slane %v275_v5, %v279_v4  ;;  %v964_v9 = vrot.slane %v275_v5, %v287_v6  ;;  %s587_s12 = sshll.u32 %s874_s4, 4  ;;  %s588_s12 = int_to_ptr.vmem [resolvable:$true] %s587_s12 }
  0x3a   :  { %s840_s13 = scalar_lea.vmem %s588_s12, 3072  ;;  %p845_p2 = scmp.lt.s32.totalorder %s588_s12, %s588_s12 }
  0x3b   :  { %429 = vmatpush1.bf16.msra.mxu1 %v766_v18  ;;  %p841_p1 = scmp.ne.s32.totalorder %s588_s12, %s840_s13  ;;  %p846_p3 = scmp.lt.s32.totalorder %s840_s13, %s840_s13 }
  0x3c   :  { %672 = vmatpush3.bf16.msra.mxu0 %v741_v10  ;;  %430 = vmatprep.subr.bf16.mxu1 %v768_v27  ;;  %v284_v10 = vrot.slane %v275_v5, %v283_v7 }
  0x3d   :  { %673 = vmatprep.subr.bf16.mxu0 %v742_v12  ;;  %p847_p4 = por %p846_p3, %p845_p2 }
  0x3f   :  { %431 = vmatpush1.bf16.msra.mxu1 %v770_v28  ;;  %p848_p5 = pnand %p847_p4, %p841_p1 }
  0x40   :  { %674 = vmatpush3.bf16.msra.mxu0 %v742_v12  ;;  %432 = vmatprep.subr.bf16.mxu1 %v772_v30 }
  0x41   :  { %675 = vmatprep.subr.bf16.mxu0 %v743_v15 }
  0x43   :  { %433 = vmatpush1.bf16.msra.mxu1 %v774_v31 }
  0x44   :  { %676 = vmatpush3.bf16.msra.mxu0 %v743_v15  ;;  %434 = vmatprep.subr.bf16.mxu1 %v776_v33 }
  0x45   :  { %685 = vmatprep.subr.bf16.mxu0 %v916_v19 }
  0x47   :  { %678 = vmatmul.mubr.bf16.vlgmr.msra.gmra.mxu0 %v745_v20  ;;  %435 = vmatpush1.bf16.msra.mxu1 %v778_v34 }
  0x48   :  { %681 = vmatprep.mubr.bf16.mxu0 %v746_v21  ;;  %686 = vmatpush3.bf16.msra.mxu0 %v916_v19 }
  0x49   :  { %687 = vmatprep.subr.bf16.mxu0 %v919_v22  ;;  %709 = vmatprep.subr.bf16.mxu1 %v916_v19 }
  0x4c   :  { %688 = vmatpush3.bf16.msra.mxu0 %v919_v22 }
  0x4d   :  { %689 = vmatprep.subr.bf16.mxu0 %v923_v23 }
  0x4f   :  { %682 = vmatmul.mubr.bf16.gmra.mxu0 %v747_v24 }
  0x50   :  { %690 = vmatpush3.bf16.msra.mxu0 %v923_v23 }
  0x51   :  { %691 = vmatprep.subr.bf16.mxu0 %v927_v25 }
  0x54   :  { %692 = vmatpush3.bf16.msra.mxu0 %v927_v25 }
  0x55   :  { %693 = vmatprep.subr.bf16.mxu0 %v931_v26 }
  0x58   :  { %694 = vmatpush3.bf16.msra.mxu0 %v931_v26 }
  0x59   :  { %695 = vmatprep.subr.bf16.mxu0 %v936_v29 }
  0x5c   :  { %696 = vmatpush3.bf16.msra.mxu0 %v936_v29 }
  0x5d   :  { %697 = vmatprep.subr.bf16.mxu0 %v940_v32 }
  0x60   :  { %698 = vmatpush3.bf16.msra.mxu0 %v940_v32 }
  0x61   :  { %699 = vmatprep.subr.bf16.mxu0 %v779_v35 }
  0x64   :  { %700 = vmatpush3.bf16.msra.mxu0 %v779_v35 }
 0x107   :  { %v679_v37 = vpop.f32.mrf.mxu0 }
 0x108   :  { %v209_v43 = vadd.f32 %v679_v37, %v600_v39 }
 0x109   :  { %v200_v38 = vpop.f32.mrf.mxu0 }
 0x10a   :  { %v201_v41 = vadd.f32 %v600_v39, %v200_v38  ;;  %v233_v50 = vmax.f32 %v209_v43, 0.0 }
 0x10b   :  { %v680_v40 = vpop.f32.mrf.mxu0 }
 0x10c   :  { %v212_v42 = vadd.f32 %v680_v40, %v600_v39  ;;  %v231_v48 = vmax.f32 %v201_v41, 0.0 }
 0x10d   :  { %v203_v44 = vpop.f32.mrf.mxu0 }
 0x10e   :  { %v204_v45 = vadd.f32 %v600_v39, %v203_v44  ;;  %v234_v46 = vmax.f32 %v212_v42, 0.0 }
 0x10f   :  { %v683_v47 = vpop.f32.mrf.mxu0 }
 0x110   :  { %v232_v49 = vmax.f32 %v204_v45, 0.0  ;;  %v240_v53 = vpack.c.bf16 %v234_v46, %v233_v50  ;;  %v225_v60 = vadd.f32 %v683_v47, %v600_v39 }
 0x111   :  { %v216_v51 = vpop.f32.mrf.mxu0 }
 0x112   :  { %v239_v52 = vpack.c.bf16 %v232_v49, %v231_v48  ;;  %v217_v56 = vadd.f32 %v600_v39, %v216_v51  ;;  %v237_v63 = vmax.f32 %v225_v60, 0.0 }
 0x113   :  { %v684_v54 = vpop.f32.mrf.mxu0 }
 0x114   :  { %453 = vmatmul.mubr.bf16.vlgmr.msra.gmra.mxu1 %v239_v52  ;;  %701 = vmatprep.mubr.bf16.mxu0 %v239_v52  ;;  %v235_v58 = vmax.f32 %v217_v56, 0.0  ;;  %v228_v61 = vadd.f32 %v684_v54, %v600_v39 }
 0x115   :  { %717 = vmatpush3.bf16.msra.mxu1 %v916_v19  ;;  %702 = vmatmul.mubr.bf16.vlgmr.msra.gmra.mxu0 %v240_v53  ;;  %v219_v55 = vpop.f32.mrf.mxu0 }
 0x116   :  { %710 = vmatprep.subr.bf16.mxu1 %v919_v22  ;;  %462 = vmatprep.mubr.bf16.mxu1 %v873_v36  ;;  %v220_v57 = vadd.f32 %v600_v39, %v219_v55  ;;  %v238_v0 = vmax.f32 %v228_v61, 0.0 }
 0x118   :  { %v236_v59 = vmax.f32 %v220_v57, 0.0  ;;  %v242_v1 = vpack.c.bf16 %v238_v0, %v237_v63 }
 0x119   :  { %718 = vmatpush3.bf16.msra.mxu1 %v919_v22 }
 0x11a   :  { %711 = vmatprep.subr.bf16.mxu1 %v923_v23  ;;  %v241_v62 = vpack.c.bf16 %v236_v59, %v235_v58 }
 0x11c   :  { %463 = vmatmul.mubr.bf16.gmra.mxu1 %v240_v53 }
 0x11d   :  { %719 = vmatpush3.bf16.msra.mxu1 %v923_v23  ;;  %472 = vmatprep.mubr.bf16.mxu1 %v873_v36 }
 0x11e   :  { %712 = vmatprep.subr.bf16.mxu1 %v927_v25 }
 0x121   :  { %720 = vmatpush3.bf16.msra.mxu1 %v927_v25 }
 0x122   :  { %713 = vmatprep.subr.bf16.mxu1 %v931_v26 }
 0x124   :  { %473 = vmatmul.mubr.bf16.gmra.mxu1 %v241_v62 }
 0x125   :  { %721 = vmatpush3.bf16.msra.mxu1 %v931_v26  ;;  %482 = vmatprep.mubr.bf16.mxu1 %v873_v36 }
 0x126   :  { %714 = vmatprep.subr.bf16.mxu1 %v936_v29 }
 0x129   :  { %722 = vmatpush3.bf16.msra.mxu1 %v936_v29 }
 0x12a   :  { %715 = vmatprep.subr.bf16.mxu1 %v940_v32 }
 0x12c   :  { %483 = vmatmul.mubr.bf16.gmra.mxu1 %v242_v1 }
 0x12d   :  { %723 = vmatpush3.bf16.msra.mxu1 %v940_v32  ;;  %705 = vmatprep.mubr.bf16.mxu1 %v241_v62 }
 0x12e   :  { %716 = vmatprep.subr.bf16.mxu1 %v779_v35 }
 0x131   :  { %724 = vmatpush3.bf16.msra.mxu1 %v779_v35 }
 0x134   :  { %706 = vmatmul.mubr.bf16.vlgmr.msra.gmra.mxu1 %v242_v1 }
 0x1d4   :  { %v454_v11 = vpop.f32.mrf.mxu1 }
 0x1d5   :  { %v455_v12 = vadd.f32 %v454_v11, %v280_v8  ;;  %v703_v13 = vpop.f32.mrf.mxu0 }
 0x1d6   :  { %v536_v14 = vadd.f32 %v703_v13, %v964_v9  ;;  %v456_v15 = vpop.f32.mrf.mxu1 }
 0x1d7   :  { %558 = vst [vmem:[#allocation8] sm:$0xff] %v455_v12  ;;  %v457_v16 = vadd.f32 %v456_v15, %v284_v10  ;;  %v527_v17 = vpop.f32.mrf.mxu0 }
 0x1d8   :  { %566 = vst [vmem:[#allocation8 + $0x40] sm:$0xff] %v536_v14  ;;  %v528_v18 = vadd.f32 %v527_v17, %v964_v9  ;;  %v458_v19 = vpop.f32.mrf.mxu1 }
 0x1d9   :  { %559 = vst [vmem:[#allocation8 + $0x8] sm:$0xff] %v457_v16  ;;  %v459_v20 = vadd.f32 %v458_v19, %v280_v8  ;;  %v704_v21 = vpop.f32.mrf.mxu0 }
 0x1da   :  { %560 = vst [vmem:[#allocation8 + $0x10] sm:$0xff] %v528_v18  ;;  %v539_v22 = vadd.f32 %v704_v21, %v964_v9  ;;  %v460_v23 = vpop.f32.mrf.mxu1 }
 0x1db   :  { %561 = vst [vmem:[#allocation8 + $0x18] sm:$0xff] %v459_v20  ;;  %v461_v24 = vadd.f32 %v460_v23, %v284_v10  ;;  %v530_v25 = vpop.f32.mrf.mxu0 }
 0x1dc   :  { %569 = vst [vmem:[#allocation8 + $0x58] sm:$0xff] %v539_v22  ;;  %v531_v26 = vadd.f32 %v530_v25, %v964_v9  ;;  %v464_v27 = vpop.f32.mrf.mxu1 }
 0x1dd   :  { %562 = vst [vmem:[#allocation8 + $0x20] sm:$0xff] %v461_v24  ;;  %v465_v28 = vadd.f32 %v464_v27, %v280_v8 }
 0x1de   :  { %563 = vst [vmem:[#allocation8 + $0x28] sm:$0xff] %v531_v26  ;;  %v466_v29 = vpop.f32.mrf.mxu1 }
 0x1df   :  { %564 = vst [vmem:[#allocation8 + $0x30] sm:$0xff] %v465_v28  ;;  %v467_v30 = vadd.f32 %v466_v29, %v284_v10 }
 0x1e0   :  { %v468_v31 = vpop.f32.mrf.mxu1 }
 0x1e1   :  { %565 = vst [vmem:[#allocation8 + $0x38] sm:$0xff] %v467_v30  ;;  %v469_v32 = vadd.f32 %v468_v31, %v280_v8 }
 0x1e2   :  { %v470_v33 = vpop.f32.mrf.mxu1 }
 0x1e3   :  { %567 = vst [vmem:[#allocation8 + $0x48] sm:$0xff] %v469_v32  ;;  %v471_v34 = vadd.f32 %v470_v33, %v284_v10 }
 0x1e4   :  { %v474_v35 = vpop.f32.mrf.mxu1 }
 0x1e5   :  { %568 = vst [vmem:[#allocation8 + $0x50] sm:$0xff] %v471_v34  ;;  %v475_v36 = vadd.f32 %v474_v35, %v280_v8 }
 0x1e6   :  { %v476_v37 = vpop.f32.mrf.mxu1 }
 0x1e7   :  { %570 = vst [vmem:[#allocation8 + $0x60] sm:$0xff] %v475_v36  ;;  %v477_v38 = vadd.f32 %v476_v37, %v284_v10 }
 0x1e8   :  { %v478_v39 = vpop.f32.mrf.mxu1 }
 0x1e9   :  { %571 = vst [vmem:[#allocation8 + $0x68] sm:$0xff] %v477_v38  ;;  %v479_v40 = vadd.f32 %v478_v39, %v280_v8 }
 0x1ea   :  { %v480_v41 = vpop.f32.mrf.mxu1 }
 0x1eb   :  { %573 = vst [vmem:[#allocation8 + $0x78] sm:$0xff] %v479_v40  ;;  %v481_v42 = vadd.f32 %v480_v41, %v284_v10 }
 0x1ec   :  { %v484_v43 = vpop.f32.mrf.mxu1 }
 0x1ed   :  { %574 = vst [vmem:[#allocation8 + $0x80] sm:$0xff] %v481_v42  ;;  %v485_v44 = vadd.f32 %v484_v43, %v280_v8 }
 0x1ee   :  { %v486_v45 = vpop.f32.mrf.mxu1 }
 0x1ef   :  { %576 = vst [vmem:[#allocation8 + $0x90] sm:$0xff] %v485_v44  ;;  %v487_v46 = vadd.f32 %v486_v45, %v284_v10 }
 0x1f0   :  { %v488_v47 = vpop.f32.mrf.mxu1 }
 0x1f1   :  { %577 = vst [vmem:[#allocation8 + $0x98] sm:$0xff] %v487_v46  ;;  %v489_v48 = vadd.f32 %v488_v47, %v280_v8 }
 0x1f2   :  { %v490_v49 = vpop.f32.mrf.mxu1 }
 0x1f3   :  { %579 = vst [vmem:[#allocation8 + $0xa8] sm:$0xff] %v489_v48  ;;  %v491_v50 = vadd.f32 %v490_v49, %v284_v10 }
 0x1f4   :  { %v707_v51 = vpop.f32.mrf.mxu1 }
 0x1f5   :  { %580 = vst [vmem:[#allocation8 + $0xb0] sm:$0xff] %v491_v50  ;;  %v552_v52 = vadd.f32 %v707_v51, %v964_v9 }
 0x1f6   :  { %v543_v53 = vpop.f32.mrf.mxu1 }
 0x1f7   :  { %578 = vst [vmem:[#allocation8 + $0xa0] sm:$0xff] %v552_v52  ;;  %v544_v54 = vadd.f32 %v543_v53, %v964_v9 }
 0x1f8   :  { %v708_v55 = vpop.f32.mrf.mxu1 }
 0x1f9   :  { %572 = vst [vmem:[#allocation8 + $0x70] sm:$0xff] %v544_v54  ;;  %v555_v56 = vadd.f32 %v708_v55, %v964_v9 }
 0x1fa   :  { %v546_v57 = vpop.f32.mrf.mxu1 }
 0x1fb   :  { %581 = vst [vmem:[#allocation8 + $0xb8] sm:$0xff] %v555_v56  ;;  %v547_v58 = vadd.f32 %v546_v57, %v964_v9 }
 0x1fd   :  { %575 = vst [vmem:[#allocation8 + $0x88] sm:$0xff] %v547_v58 }
 0x1fe   :  { %851 = shalt.err (!%p848_p5)
}
 0x1ff   :  { %s875_s14 = smov 384   ;;  %s876_s15 = smov 24  }
 0x200   :  { %593 = dma.vmem_to_hbm [thread:$0]  %s588_s12, 3072, %s982_s5, [#allocation4], %s875_s14, %s875_s14, %s876_s15  }
 0x201   :  { %864 = dma.done.wait [#allocation4], 3072  }
 0x202   :  { %865 = vsyncadd [#allocation4], 4294964224 }
 0x203   :  { %597 = vsyncpa [#allocation3], 1 }
 0x204   :  { %598 = vsyncpa [#allocation6], 1 }
 0x205   :  { %599 = vsyncpa [#allocation4], 1 }

</bundles_post_ra>
